<compile_context>
chip_gen: v7x
topology: tpu7x:2x2x1
jax: 0.10.0
libtpu: 0.0.40
codegen_flags: <defaults>
</compile_context>

<pallas_src>
import functools

import jax
import jax.numpy as jnp
from jax.experimental import pallas as pl
from jax.experimental.pallas import tpu as pltpu

_NEG_SLOPE = 0.2
_POS_SLOPE = 0.2


def _leaky_custom_activation_kernel(x_ref, o_ref, *, negative_slope, positive_slope):
    x = x_ref[...]
    c = jnp.clip(x, -1.0, 1.0)
    out = 0.5 * c + 0.5
    out = out + negative_slope * jnp.minimum(x + 1.0, 0.0)
    out = out + positive_slope * jnp.maximum(x - 1.0, 0.0)
    o_ref[...] = out.astype(o_ref.dtype)


def _pick_lanes(total, last_dim):
    # Largest lane-dense width (multiple of 128) that evenly divides the
    # element count; fall back to the original trailing dim otherwise.
    for lanes in (1024, 512, 256, 128):
        if total % lanes == 0:
            return lanes
    return last_dim


def _pick_row_tile(rows, lanes, itemsize):
    # ~4 MiB blocks: big enough to hit the HBM roofline, small enough that
    # double-buffered in+out fits every generation's scoped VMEM budget.
    row_mult = max(8, 32 // itemsize)          # 8 for f32, 16 for bf16, 32 for int8
    target_bytes = 4 * 1024 * 1024
    target_rows = max(row_mult, target_bytes // max(lanes * itemsize, 1))
    if rows <= target_rows or rows % row_mult != 0:
        return rows                            # single block == full array dims (always legal)
    cand = (target_rows // row_mult) * row_mult
    while cand >= row_mult:
        if rows % cand == 0:
            return cand
        cand -= row_mult
    return rows


def leaky_custom_activation(x, negative_slope=_NEG_SLOPE, positive_slope=_POS_SLOPE):
    orig_shape = x.shape
    total = 1
    for d in orig_shape:
        total *= d
    itemsize = jnp.dtype(x.dtype).itemsize

    lanes = _pick_lanes(total, orig_shape[-1])
    rows = total // lanes
    x2d = x.reshape(rows, lanes)

    tr = _pick_row_tile(rows, lanes, itemsize)
    grid = (rows // tr,)

    kernel = functools.partial(
        _leaky_custom_activation_kernel,
        negative_slope=negative_slope,
        positive_slope=positive_slope,
    )

    out2d = pl.pallas_call(
        kernel,
        out_shape=jax.ShapeDtypeStruct((rows, lanes), x.dtype),
        grid=grid,
        in_specs=[pl.BlockSpec((tr, lanes), lambda i: (i, 0))],
        out_specs=pl.BlockSpec((tr, lanes), lambda i: (i, 0)),
        compiler_params=pltpu.CompilerParams(
            dimension_semantics=("parallel",)),
    )(x2d)

    return out2d.reshape(orig_shape)


def _reference(x, negative_slope=_NEG_SLOPE, positive_slope=_POS_SLOPE):
    return jnp.where(
        x <= -1,
        negative_slope * (x + 1),
        jnp.where(x >= 1, positive_slope * (x - 1) + 1, 0.5 * x + 0.5),
    )


if __name__ == "__main__":
    key = jax.random.PRNGKey(0)
    # Small NCHW-like input, scaled so all three branches are exercised.
    x = jax.random.normal(key, (2, 4, 16, 16), dtype=jnp.float32) * 2.0

    out = leaky_custom_activation(x)
    jax.block_until_ready(out)

    ref = _reference(x)
    assert out.shape == x.shape and out.dtype == x.dtype
    assert jnp.allclose(out, ref, atol=1e-6), "mismatch vs reference"

    print("KERNEL_OK")
</pallas_src>

<mosaic_0001>
module attributes {stable_mosaic.version = 11 : i64} {
  func.func @_leaky_custom_activation_kernel(%arg0: i32, %arg1: memref<2x1024xf32, #tpu.memory_space<vmem>>, %arg2: memref<2x1024xf32, #tpu.memory_space<vmem>>) attributes {dimension_semantics = [#tpu.dimension_semantics<parallel>], iteration_bounds = array<i64: 1>, scalar_prefetch = 0 : i64, scratch_operands = 0 : i64, tpu.core_type = #tpu.core_type<tc>, window_params = [{transform_indices = @transform_0, window_bounds = array<i64: 2, 1024>}, {transform_indices = @transform_1, window_bounds = array<i64: 2, 1024>}]} {
    %c0 = arith.constant 0 : index
    %c0_0 = arith.constant 0 : index
    %0 = vector.load %arg1[%c0, %c0_0] : memref<2x1024xf32, #tpu.memory_space<vmem>>, vector<2x1024xf32>
    %cst = arith.constant -1.000000e+00 : f32
    %cst_1 = arith.constant 1.000000e+00 : f32
    %1 = vector.broadcast %cst : f32 to vector<2x1024xf32>
    %2 = arith.maximumf %1, %0 : vector<2x1024xf32>
    %3 = vector.broadcast %cst_1 : f32 to vector<2x1024xf32>
    %4 = arith.minimumf %3, %2 : vector<2x1024xf32>
    %cst_2 = arith.constant 5.000000e-01 : f32
    %5 = vector.broadcast %cst_2 : f32 to vector<2x1024xf32>
    %6 = arith.mulf %5, %4 : vector<2x1024xf32>
    %cst_3 = arith.constant 5.000000e-01 : f32
    %7 = vector.broadcast %cst_3 : f32 to vector<2x1024xf32>
    %8 = arith.addf %6, %7 : vector<2x1024xf32>
    %cst_4 = arith.constant 1.000000e+00 : f32
    %9 = vector.broadcast %cst_4 : f32 to vector<2x1024xf32>
    %10 = arith.addf %0, %9 : vector<2x1024xf32>
    %cst_5 = arith.constant 0.000000e+00 : f32
    %11 = vector.broadcast %cst_5 : f32 to vector<2x1024xf32>
    %12 = arith.minimumf %10, %11 : vector<2x1024xf32>
    %cst_6 = arith.constant 2.000000e-01 : f32
    %13 = vector.broadcast %cst_6 : f32 to vector<2x1024xf32>
    %14 = arith.mulf %13, %12 : vector<2x1024xf32>
    %15 = arith.addf %8, %14 : vector<2x1024xf32>
    %cst_7 = arith.constant 1.000000e+00 : f32
    %16 = vector.broadcast %cst_7 : f32 to vector<2x1024xf32>
    %17 = arith.subf %0, %16 : vector<2x1024xf32>
    %cst_8 = arith.constant 0.000000e+00 : f32
    %18 = vector.broadcast %cst_8 : f32 to vector<2x1024xf32>
    %19 = arith.maximumf %17, %18 : vector<2x1024xf32>
    %cst_9 = arith.constant 2.000000e-01 : f32
    %20 = vector.broadcast %cst_9 : f32 to vector<2x1024xf32>
    %21 = arith.mulf %20, %19 : vector<2x1024xf32>
    %22 = arith.addf %15, %21 : vector<2x1024xf32>
    %c0_10 = arith.constant 0 : index
    %c0_11 = arith.constant 0 : index
    %23 = vector.load %arg2[%c0_10, %c0_11] : memref<2x1024xf32, #tpu.memory_space<vmem>>, vector<2x1024xf32>
    tpu.vector_store %arg2[%c0_10, %c0_11], %22 {strides = array<i32>} : memref<2x1024xf32, #tpu.memory_space<vmem>>, vector<2x1024xf32>,
    return
  }
  func.func @transform_0(%arg0: i32) -> (i32, i32) {
    %c0_i32 = arith.constant 0 : i32
    %c0_i32_0 = arith.constant 0 : i32
    return %arg0, %c0_i32 : i32, i32
  }
  func.func @transform_1(%arg0: i32) -> (i32, i32) {
    %c0_i32 = arith.constant 0 : i32
    %c0_i32_0 = arith.constant 0 : i32
    return %arg0, %c0_i32 : i32, i32
  }
}

</mosaic_0001>

<bundles_post_ra>
// kernel: tpu_custom_call.1
= control target key start
LH: loop header
LB: loop body
LE: loop exit
PB: predicated region body
PF: predicated region fallthrough
CT: control target
= control target key end

     0   :  { %6 = vsyncpa [#allocation3], 0  ;;  %s154_s0 = inlined_call_operand.hbm [shape: f32[2,1024], index: 0, kind: input, shape index: {}]   ;;  %s155_s1 = inlined_call_operand.hbm [shape: f32[2,1024], index: 1, kind: output, shape index: {}]  }
   0x1   :  { %7 = vsyncpa [#allocation4], 0  ;;  %s118_s6 = smov [#allocation2]   ;;  %s70_s10 = scalar_lea.hbm %s154_s0, 256 }
   0x2   :  { %s14_s7 = sshll.u32 %s118_s6, 4  ;;  %p71_p0 = scmp.ne.s32.totalorder %s154_s0, %s70_s10  ;;  %s15_s7 = int_to_ptr.vmem [resolvable:$true] %s14_s7 }
   0x3   :  { %p74_p1 = scmp.lt.u32.totalorder %s70_s10, %s154_s0 }
   0x5   :  { %p76_p2 = pnand %p74_p1, %p71_p0 }
   0x7   :  { %79 = shalt.err (!%p76_p2)
}
   0x8   :  { %s80_s15 = scalar_lea.vmem %s15_s7, 256  ;;  %p85_p4 = scmp.lt.s32.totalorder %s15_s7, %s15_s7 }
   0x9   :  { %p81_p3 = scmp.ne.s32.totalorder %s15_s7, %s80_s15  ;;  %p86_p5 = scmp.lt.s32.totalorder %s80_s15, %s80_s15 }
   0xb   :  { %p87_p6 = por %p86_p5, %p85_p4 }
   0xd   :  { %p88_p7 = pnand %p87_p6, %p81_p3 }
   0xf   :  { %91 = shalt.err (!%p88_p7)
}
  0x10   :  { %17 = dma.hbm_to_vmem [thread:$0]  %s154_s0, 256, %s15_s7, [#allocation3]  }
  0x11   :  { %114 = dma.done.wait [#allocation3], 256  }
  0x12   :  { %115 = vsyncadd [#allocation3], 4294967040  ;;  %v21_v0 = vld [vmem:[#allocation2] sm:$0xff]  ;;  %v22_v1 = vld [vmem:[#allocation2 + $0x8] sm:$0xff]  ;;  %s119_s0 = smov [#allocation5]  }
  0x13   :  { %v64_v2 = vclamps-f32 %v21_v0, 1.0  ;;  %v31_v3 = vadd.f32 1.0, %v21_v0  ;;  %v66_v4 = vadd.f32 -1.0, %v21_v0  ;;  %v65_v5 = vclamps-f32 %v22_v1, 1.0  ;;  %s55_s18 = sshll.u32 %s119_s0, 4  ;;  %s56_s18 = int_to_ptr.vmem [resolvable:$true] %s55_s18 }
  0x14   :  { %v32_v6 = vadd.f32 1.0, %v22_v1  ;;  %v67_v7 = vadd.f32 -1.0, %v22_v1  ;;  %s92_s19 = scalar_lea.vmem %s56_s18, 256  ;;  %p97_p9 = scmp.lt.s32.totalorder %s56_s18, %s56_s18 }
  0x15   :  { %v27_v8 = vmul.f32 0.5, %v64_v2  ;;  %v33_v9 = vmin.f32 %v31_v3, 0.0  ;;  %v41_v10 = vmax.f32 %v66_v4, 0.0  ;;  %v28_v11 = vmul.f32 0.5, %v65_v5  ;;  %p93_p8 = scmp.ne.s32.totalorder %s56_s18, %s92_s19  ;;  %p98_p10 = scmp.lt.s32.totalorder %s92_s19, %s92_s19 }
  0x16   :  { %v34_v12 = vmin.f32 %v32_v6, 0.0  ;;  %v42_v13 = vmax.f32 %v67_v7, 0.0 }
  0x17   :  { %v29_v14 = vadd.f32 0.5, %v27_v8  ;;  %v35_v15 = vmul.f32 0.2, %v33_v9  ;;  %v43_v16 = vmul.f32 0.2, %v41_v10  ;;  %v30_v17 = vadd.f32 0.5, %v28_v11  ;;  %p99_p11 = por %p98_p10, %p97_p9 }
  0x18   :  { %v36_v18 = vmul.f32 0.2, %v34_v12  ;;  %v44_v19 = vmul.f32 0.2, %v42_v13 }
  0x19   :  { %v37_v20 = vadd.f32 %v35_v15, %v29_v14  ;;  %p100_p12 = pnand %p99_p11, %p93_p8 }
  0x1a   :  { %v38_v21 = vadd.f32 %v36_v18, %v30_v17 }
  0x1b   :  { %v45_v22 = vadd.f32 %v43_v16, %v37_v20 }
  0x1c   :  { %v46_v23 = vadd.f32 %v44_v19, %v38_v21 }
  0x1d   :  { %47 = vst [vmem:[#allocation5] sm:$0xff] %v45_v22 }
  0x1e   :  { %48 = vst [vmem:[#allocation5 + $0x8] sm:$0xff] %v46_v23 }
  0x1f   :  { %103 = shalt.err (!%p100_p12)
}
  0x20   :  { %s104_s22 = scalar_lea.hbm %s155_s1, 256 }
  0x21   :  { %p105_p13 = scmp.ne.s32.totalorder %s155_s1, %s104_s22  ;;  %p108_p0 = scmp.lt.u32.totalorder %s104_s22, %s155_s1 }
  0x23   :  { %p110_p1 = pnand %p108_p0, %p105_p13 }
  0x25   :  { %113 = shalt.err (!%p110_p1)
}
  0x26   :  { %58 = dma.vmem_to_hbm [thread:$0]  %s56_s18, 256, %s155_s1, [#allocation4]  }
  0x27   :  { %116 = dma.done.wait [#allocation4], 256  }
  0x28   :  { %117 = vsyncadd [#allocation4], 4294967040 }
  0x29   :  { %62 = vsyncpa [#allocation3], 1 }
  0x2a   :  { %63 = vsyncpa [#allocation4], 1 }

</bundles_post_ra>
